<compile_context>
chip_gen: v5e
topology: v5e:2x2
jax: 0.10.0
libtpu: 0.0.40
codegen_flags: <defaults>
</compile_context>

<pallas_src>
import functools

import jax
import jax.numpy as jnp
from jax.experimental import pallas as pl
from jax.experimental.pallas import tpu as pltpu


# --------------------------------------------------------------------------
# kernels
# --------------------------------------------------------------------------
def _flip_kernel(x_ref, o_ref):
    # Pure lane reverse (data movement only); native dtype, zero FLOPs.
    o_ref[...] = jnp.flip(x_ref[...], axis=-1)


def _flip_matmul_kernel(x_ref, p_ref, o_ref):
    # Fallback: y = x @ P with P the anti-identity permutation (exact for
    # floating inputs).  P arrives as a resident input, NOT rebuilt here.
    y = jax.lax.dot_general(
        x_ref[...], p_ref[...],
        dimension_numbers=(((1,), (0,)), ((), ())),
        preferred_element_type=jnp.float32,
    )
    o_ref[...] = y.astype(o_ref.dtype)


# --------------------------------------------------------------------------
# tiling
# --------------------------------------------------------------------------
def _sublane(dtype) -> int:
    return {1: 32, 2: 16, 4: 8}.get(jnp.dtype(dtype).itemsize, 8)


def _pick_batch_tile(n_rows, d, dtype, target_block_bytes=2 << 20):
    """Rows per block: ~target_block_bytes, a multiple of the sublane tile."""
    sub = _sublane(dtype)
    itemsize = jnp.dtype(dtype).itemsize
    rows = max(sub, target_block_bytes // max(d * itemsize, 1))
    rows = (rows // sub) * sub
    if rows >= n_rows:
        # Whole array fits one block.  If it carries real traffic, still split
        # it in two so both v7x TensorCores get a grid step each.
        if n_rows >= 2 * sub and n_rows * d * itemsize > (1 << 20):
            half = (n_rows + 1) // 2
            return ((half + sub - 1) // sub) * sub
        return n_rows  # block == full array dim: always a legal block shape
    return rows


_COMPILER_PARAMS = pltpu.CompilerParams(
    dimension_semantics=("parallel",),
    vmem_limit_bytes=48 << 20,
)


@functools.lru_cache(maxsize=None)
def _build_flip_call(n_rows, d, dtype_name, tb):
    dtype = jnp.dtype(dtype_name)
    return pl.pallas_call(
        _flip_kernel,
        out_shape=jax.ShapeDtypeStruct((n_rows, d), dtype),
        grid_spec=pltpu.PrefetchScalarGridSpec(
            num_scalar_prefetch=0,
            grid=(pl.cdiv(n_rows, tb),),
            in_specs=[pl.BlockSpec((tb, d), lambda i: (i, 0))],
            out_specs=pl.BlockSpec((tb, d), lambda i: (i, 0)),
        ),
        compiler_params=_COMPILER_PARAMS,
    )


@functools.lru_cache(maxsize=None)
def _build_matmul_call(n_rows, d, dtype_name, tb):
    dtype = jnp.dtype(dtype_name)
    return pl.pallas_call(
        _flip_matmul_kernel,
        out_shape=jax.ShapeDtypeStruct((n_rows, d), dtype),
        grid_spec=pltpu.PrefetchScalarGridSpec(
            num_scalar_prefetch=0,
            grid=(pl.cdiv(n_rows, tb),),
            in_specs=[
                pl.BlockSpec((tb, d), lambda i: (i, 0)),
                pl.BlockSpec((d, d), lambda i: (0, 0)),  # resident, constant
            ],
            out_specs=pl.BlockSpec((tb, d), lambda i: (i, 0)),
        ),
        compiler_params=_COMPILER_PARAMS,
    )


_FLIP_LOWERS = None  # None = unknown; True/False after the first call


def _flip_last_dim_2d(x2d):
    """flip(x2d, axis=-1) via a Pallas TPU kernel; x2d has shape (N, D)."""
    global _FLIP_LOWERS
    n, d = x2d.shape
    tb = _pick_batch_tile(n, d, x2d.dtype)

    if _FLIP_LOWERS is not False:
        try:
            y = _build_flip_call(n, d, str(x2d.dtype), tb)(x2d)
            _FLIP_LOWERS = True
            return y
        except Exception:
            if _FLIP_LOWERS:  # it worked before -> a genuine runtime error
                raise
            _FLIP_LOWERS = False  # lax.rev not lowerable: use matmul fallback

    pdtype = x2d.dtype if jnp.issubdtype(x2d.dtype, jnp.floating) else jnp.float32
    perm = jnp.flip(jnp.eye(d, dtype=pdtype), axis=0)  # built once, on host/XLA
    xin = x2d if jnp.issubdtype(x2d.dtype, jnp.floating) else x2d.astype(pdtype)
    y = _build_matmul_call(n, d, str(xin.dtype), tb)(xin, perm)
    return y.astype(x2d.dtype)


# --------------------------------------------------------------------------
# public API mirroring the PyTorch module
# --------------------------------------------------------------------------
def reverse_seq_flow_forward(x, ldj):
    """Pallas implementation of ReverseSeqFlow.forward(x, ldj)."""
    orig_shape = x.shape
    d = orig_shape[-1]
    y = _flip_last_dim_2d(x.reshape((-1, d))).reshape(orig_shape)
    # ldj is untouched by this flow (fixed permutation is volume preserving).
    return y, ldj


def reverse_seq_flow_reverse(x):
    """Pallas implementation of ReverseSeqFlow.reverse(x)."""
    return reverse_seq_flow_forward(x, None)[0]


if __name__ == "__main__":
    key = jax.random.PRNGKey(0)
    kx, kl, kz = jax.random.split(key, 3)

    # Small shapes consistent with the flow layer: batch=8, latent dim=32.
    B, D = 8, 32
    x = jax.random.normal(kx, (B, D), dtype=jnp.float32)
    ldj = jax.random.normal(kl, (B,), dtype=jnp.float32)

    y, ldj_out = reverse_seq_flow_forward(x, ldj)
    y = jax.block_until_ready(y)
    ldj_out = jax.block_until_ready(ldj_out)

    assert y.shape == x.shape and y.dtype == x.dtype
    assert jnp.array_equal(y, jnp.flip(x, axis=-1))
    assert jnp.array_equal(ldj_out, ldj)

    # reverse() is its own inverse.
    x_back = jax.block_until_ready(reverse_seq_flow_reverse(y))
    assert jnp.array_equal(x_back, x)

    # Non-divisible batch + 3-D input (flip is along the last axis only).
    z = jax.random.normal(kz, (3, 5, 48), dtype=jnp.float32)
    z_rev, _ = reverse_seq_flow_forward(z, None)
    z_rev = jax.block_until_ready(z_rev)
    assert jnp.array_equal(z_rev, jnp.flip(z, axis=-1))

    print("KERNEL_OK")
</pallas_src>

<mosaic_0001>
module attributes {stable_mosaic.version = 11 : i64} {
  func.func @_flip_matmul_kernel(%arg0: i32, %arg1: memref<8x32xf32, #tpu.memory_space<vmem>>, %arg2: memref<32x32xf32, #tpu.memory_space<vmem>>, %arg3: memref<8x32xf32, #tpu.memory_space<vmem>>) attributes {dimension_semantics = [#tpu.dimension_semantics<parallel>], iteration_bounds = array<i64: 1>, scalar_prefetch = 0 : i64, scratch_operands = 0 : i64, tpu.core_type = #tpu.core_type<tc>, window_params = [{transform_indices = @transform_0, window_bounds = array<i64: 8, 32>}, {pipeline_mode = #tpu.pipeline_mode<synchronous>, transform_indices = @transform_1, window_bounds = array<i64: 32, 32>}, {transform_indices = @transform_2, window_bounds = array<i64: 8, 32>}]} {
    %c0 = arith.constant 0 : index
    %c0_0 = arith.constant 0 : index
    %0 = vector.load %arg1[%c0, %c0_0] : memref<8x32xf32, #tpu.memory_space<vmem>>, vector<8x32xf32>
    %c0_1 = arith.constant 0 : index
    %c0_2 = arith.constant 0 : index
    %1 = vector.load %arg2[%c0_1, %c0_2] : memref<32x32xf32, #tpu.memory_space<vmem>>, vector<32x32xf32>
    %cst = arith.constant dense<0.000000e+00> : vector<8x32xf32>
    %2 = tpu.matmul %0, %1, %cst {dimension_numbers = #tpu.dot_dimension_numbers<[1], [0], [0], [1], [0, 0, 1, 1], [], []>} : vector<8x32xf32>, vector<32x32xf32>, vector<8x32xf32> -> vector<8x32xf32>
    %c0_3 = arith.constant 0 : index
    %c0_4 = arith.constant 0 : index
    %3 = vector.load %arg3[%c0_3, %c0_4] : memref<8x32xf32, #tpu.memory_space<vmem>>, vector<8x32xf32>
    tpu.vector_store %arg3[%c0_3, %c0_4], %2 {strides = array<i32>} : memref<8x32xf32, #tpu.memory_space<vmem>>, vector<8x32xf32>,
    return
  }
  func.func @transform_0(%arg0: i32) -> (i32, i32) {
    %c0_i32 = arith.constant 0 : i32
    %c0_i32_0 = arith.constant 0 : i32
    return %arg0, %c0_i32 : i32, i32
  }
  func.func @transform_1(%arg0: i32) -> (i32, i32) {
    %c0_i32 = arith.constant 0 : i32
    %c0_i32_0 = arith.constant 0 : i32
    %c0_i32_1 = arith.constant 0 : i32
    return %c0_i32, %c0_i32_0 : i32, i32
  }
  func.func @transform_2(%arg0: i32) -> (i32, i32) {
    %c0_i32 = arith.constant 0 : i32
    %c0_i32_0 = arith.constant 0 : i32
    return %arg0, %c0_i32 : i32, i32
  }
}

</mosaic_0001>

<bundles_post_ra>
// kernel: tpu_custom_call.1
= control target key start
LH: loop header
LB: loop body
LE: loop exit
PB: predicated region body
PF: predicated region fallthrough
CT: control target
= control target key end

     0   :  { %7 = vsyncpa [#allocation3], 0  ;;  %s203_s0 = inlined_call_operand.hbm [shape: f32[8,32], index: 0, kind: input, shape index: {}]   ;;  %s204_s1 = inlined_call_operand.hbm [shape: f32[32,32], index: 1, kind: input, shape index: {}]   ;;  %s205_s2 = inlined_call_operand.hbm [shape: f32[8,32], index: 2, kind: output, shape index: {}]  }
   0x1   :  { %8 = vsyncpa [#allocation6], 0 }
   0x2   :  { %9 = vsyncpa [#allocation4], 0  ;;  %s15_s11 = sshll.u32 %s203_s0, 4  ;;  %s174_s12 = smov [#allocation2]   ;;  %s16_s11 = int_to_ptr.hbm [resolvable:$true] %s15_s11 }
   0x3   :  { %s17_s13 = sshll.u32 %s174_s12, 4  ;;  %s25_s16 = sshll.u32 %s204_s1, 4  ;;  %s18_s13 = int_to_ptr.vmem [resolvable:$true] %s17_s13  ;;  %s26_s16 = int_to_ptr.hbm [resolvable:$true] %s25_s16 }
   0x4   :  { %20 = dma.hbm_to_vmem [thread:$0]  %s16_s11, 128, %s18_s13, [#allocation3]  }
   0x5   :  { %s175_s17 = smov [#allocation5]   ;;  %s176_s19 = smov 128  }
   0x6   :  { %s27_s18 = sshll.u32 %s175_s17, 4  ;;  %s177_s20 = smov 8   ;;  %s28_s18 = int_to_ptr.vmem [resolvable:$true] %s27_s18 }
   0x7   :  { %33 = dma.hbm_to_vmem [thread:$0]  %s26_s16, 512, %s28_s18, [#allocation6], %s176_s19, %s176_s19, %s177_s20  }
   0x8   :  { %168 = dma.done.wait [#allocation3], 128  }
   0x9   :  { %169 = vsyncadd [#allocation3], 4294967168 }
   0xa   :  { %170 = dma.done.wait [#allocation6], 512  }
   0xb   :  { %171 = vsyncadd [#allocation6], 4294966784  ;;  %v46_v0 = vld [vmem:[#allocation5 + $0x18] sm:$0xff]  ;;  %v45_v1 = vld [vmem:[#allocation5 + $0x10] sm:$0xff]  ;;  %vm47_vm0 = vcmask 261120   ;;  %s178_s0 = smov [#allocation7]  }
   0xc   :  { %63 = vmatpush.msra.mxu0 %v46_v0  ;;  %v44_v2 = vld [vmem:[#allocation5 + $0x8] sm:$0xff]  ;;  %v43_v3 = vld [vmem:[#allocation5] sm:$0xff]  ;;  %v42_v4 = vld [vmem:[#allocation2] sm:$0xff]  ;;  %s77_s1 = sshll.u32 %s178_s0, 4  ;;  %s79_s23 = sshll.u32 %s205_s2, 4  ;;  %s78_s1 = int_to_ptr.vmem [resolvable:$true] %s77_s1  ;;  %s80_s23 = int_to_ptr.hbm [resolvable:$true] %s79_s23 }
   0xe   :  { %64 = vmatpush.msra.mxu0 %v45_v1 }
  0x10   :  { %65 = vmatpush.msra.mxu0 %v44_v2 }
  0x12   :  { %66 = vmatpush.msra.mxu0 %v43_v3 }
  0x13   :  { %90 = vmatmul.msk.f32.vlgmr.msra.gmra.mxu0 %vm47_vm0, %v42_v4 }
  0x90   :  { %v68_v5 = vpop.f32.mrf.mxu0 }
  0x91   :  { %71 = vst.msk [vmem:[#allocation7] sm:$0xff] %vm47_vm0, %v68_v5 }
  0x92   :  { %82 = dma.vmem_to_hbm [thread:$0]  %s78_s1, 128, %s80_s23, [#allocation4]  }
  0x93   :  { %172 = dma.done.wait [#allocation4], 128  }
  0x94   :  { %173 = vsyncadd [#allocation4], 4294967168 }
  0x95   :  { %87 = vsyncpa [#allocation3], 1 }
  0x96   :  { %88 = vsyncpa [#allocation6], 1 }
  0x97   :  { %89 = vsyncpa [#allocation4], 1 }

</bundles_post_ra>
